<compile_context>
chip_gen: v7x
topology: tpu7x:2x2x1
jax: 0.10.0
libtpu: 0.0.40
codegen_flags: <defaults>
</compile_context>

<pallas_src>
import functools
import re

import jax
import jax.numpy as jnp
from jax.experimental import pallas as pl
from jax.experimental.pallas import tpu as pltpu


def _round_up(x, m):
    return (x + m - 1) // m * m


def _tpu_config():
    """Best-effort (generation, vmem_capacity_bytes, mxu_width) for the local TPU."""
    gen = 6
    try:
        kind = jax.devices()[0].device_kind.lower()
        m = re.search(r"v(\d+)", kind)
        if m:
            gen = int(m.group(1))
    except Exception:
        pass
    vmem = None
    try:
        vmem = int(getattr(pltpu.get_tpu_info(), "vmem_capacity_bytes", 0)) or None
    except Exception:
        vmem = None
    if vmem is None:
        vmem = 64 * 1024 * 1024 if gen >= 7 else 128 * 1024 * 1024
    mxu_width = 256 if gen >= 6 else 128
    return gen, vmem, mxu_width


def _const_spec(shape, index_map):
    """BlockSpec for an operand whose block never changes: keep it single-buffered."""
    try:
        return pl.BlockSpec(shape, index_map, pipeline_mode=pl.Buffered(1))
    except TypeError:  # very old jax without pipeline_mode -> default double buffering
        return pl.BlockSpec(shape, index_map)


def _layer_norm_rows(y, gamma_f32, beta_f32, d_in, eps):
    """Row-wise LayerNorm over the valid d_in lanes of a lane-padded [rows, d_in_p] f32 y.

    Relies on padded lanes of y being exactly zero (zero-padded x/W2/b2), so the
    row-sum mean needs no mask; the variance masks the centered padded lanes."""
    d_in_p = y.shape[-1]
    inv_d = jnp.float32(1.0 / d_in)
    mean = jnp.sum(y, axis=-1, keepdims=True) * inv_d
    centered = y - mean
    if d_in_p != d_in:
        lane = jax.lax.broadcasted_iota(jnp.int32, (1, d_in_p), 1)
        centered = centered * (lane < d_in).astype(jnp.float32)
    var = jnp.sum(centered * centered, axis=-1, keepdims=True) * inv_d
    inv = jax.lax.rsqrt(var + eps)  # EUP rsqrt
    return centered * inv * gamma_f32 + beta_f32


# ----------------------------- kernels ---------------------------------------------


def _ffn_resident_kernel(x_ref, w1_ref, b1_ref, w2_ref, b2_ref, g_ref, beta_ref,
                         o_ref, *, d_in, eps, mm_dtype):
    """Weights fully resident in VMEM; one row-tile of x per grid step."""
    x = x_ref[...]                                                         # [tm, d_in_p]
    h = jnp.dot(x.astype(mm_dtype), w1_ref[...],
                preferred_element_type=jnp.float32)                        # [tm, d_hid_p]
    h = jnp.maximum(h + b1_ref[...].astype(jnp.float32), 0.0)
    y = jnp.dot(h.astype(mm_dtype), w2_ref[...],
                preferred_element_type=jnp.float32)                        # [tm, d_in_p]
    y = y + b2_ref[...].astype(jnp.float32)
    # TODO(synk): dropout is identity in eval mode; training-mode dropout would use
    # pltpu.prng_seed + pltpu.stateful_bernoulli.
    y = y + x.astype(jnp.float32)                                          # residual
    out = _layer_norm_rows(y, g_ref[...].astype(jnp.float32),
                           beta_ref[...].astype(jnp.float32), d_in, eps)
    o_ref[...] = out.astype(o_ref.dtype)


def _ffn_hid_chunked_kernel(x_ref, w1_ref, b1_ref, w2_ref, b2_ref, g_ref, beta_ref,
                            o_ref, acc_ref, *, d_in, eps, mm_dtype):
    """d_hid split across the innermost ("arbitrary") grid axis; W1/W2 chunks are
    pipelined per step and partial y products accumulate in a f32 VMEM scratch."""
    k = pl.program_id(1)

    x = x_ref[...]                                                         # [tm, d_in_p]
    h = jnp.dot(x.astype(mm_dtype), w1_ref[...],
                preferred_element_type=jnp.float32)                        # [tm, th]
    h = jnp.maximum(h + b1_ref[...].astype(jnp.float32), 0.0)              # relu per chunk is exact
    part = jnp.dot(h.astype(mm_dtype), w2_ref[...],
                   preferred_element_type=jnp.float32)                     # [tm, d_in_p]

    @pl.when(k == 0)
    def _():
        acc_ref[...] = part

    @pl.when(k > 0)
    def _():
        acc_ref[...] += part

    @pl.when(k == pl.num_programs(1) - 1)
    def _():
        y = acc_ref[...] + b2_ref[...].astype(jnp.float32) + x.astype(jnp.float32)
        out = _layer_norm_rows(y, g_ref[...].astype(jnp.float32),
                               beta_ref[...].astype(jnp.float32), d_in, eps)
        o_ref[...] = out.astype(o_ref.dtype)


# ----------------------------- wrapper ----------------------------------------------


def positionwise_feed_forward(x, w1, b1, w2, b2, gamma, beta, *,
                              eps=1e-6, matmul_dtype=None, tile_m=None,
                              hid_tile=None, force_hid_chunking=False,
                              vmem_limit_bytes=None):
    """x: [batch, seq, d_in]. Weights stored transposed relative to torch.nn.Linear:
       w1: [d_in, d_hid], w2: [d_hid, d_in] so the kernel does plain x @ W."""
    batch, seq, d_in = x.shape
    d_hid = w1.shape[1]
    M = batch * seq

    _, vmem_cap, mxu_width = _tpu_config()
    if vmem_limit_bytes is None:
        # Leave headroom for Mosaic internal scratch: ~56 MiB on v7x, ~112 MiB on v5e/v6e.
        vmem_limit_bytes = vmem_cap - max(vmem_cap // 8, 8 * 1024 * 1024)
    budget = int(vmem_limit_bytes * 0.85)

    # Matmul dtype: f32 operands go to the MXU as bf16 by default (largest throughput
    # lever when upstream data is f32); accumulate + epilogue stay f32.
    if matmul_dtype is None:
        matmul_dtype = jnp.bfloat16 if x.dtype == jnp.float32 else x.dtype
    mm_dtype = jnp.dtype(matmul_dtype)
    mm_b = mm_dtype.itemsize
    x_b = jnp.dtype(x.dtype).itemsize
    out_b = x_b

    # Lane alignment: 256 for sub-f32 operands on the 256-wide MXU (v6e/v7x), else 128.
    lane_mult = 256 if (mxu_width == 256 and mm_b < 4) else 128
    d_in_p = _round_up(d_in, lane_mult)
    d_hid_p = _round_up(d_hid, lane_mult)

    # ---- VMEM footprint accounting (includes the f32 h intermediate that BlockSpec
    # accounting does not see) -------------------------------------------------------
    def tile_fp(tm, th):
        io = 2 * tm * d_in_p * (x_b + out_b)          # double-buffered x in / out tiles
        interm = tm * th * (4 + mm_b)                 # f32 h + its mm-dtype copy
        interm += tm * d_in_p * (4 + mm_b)            # f32 y + mm-dtype x copy
        return io + interm

    resident_w = 2 * d_in_p * d_hid_p * mm_b + (d_hid_p + 3 * d_in_p) * 4

    def chunked_fp(tm, th):
        wbufs = 2 * (2 * d_in_p * th * mm_b + th * 4)  # double-buffered W1/W2/b1 chunks
        resident_small = 3 * d_in_p * 4                # b2, gamma, beta
        acc = tm * d_in_p * 4                          # f32 accumulator scratch
        return wbufs + resident_small + acc + tile_fp(tm, th)

    max_tile_m = _round_up(max(M, 1), 8)
    use_chunked = force_hid_chunking or (resident_w + tile_fp(64, d_hid_p) > budget)

    if not use_chunked:
        if tile_m is None:
            tile_m = 8
            for cand in (1024, 512, 384, 256, 128, 64, 32, 16, 8):
                if resident_w + tile_fp(cand, d_hid_p) <= budget:
                    tile_m = cand
                    break
        tile_m = _round_up(max(8, min(tile_m, max_tile_m)), 8)
    else:
        if tile_m is None:
            tile_m = 256
        tile_m = _round_up(max(8, min(tile_m, max_tile_m)), 8)
        if hid_tile is None:
            hid_tile = lane_mult
            for cand in (8192, 4096, 2048, 1024, 512, 256, 128):
                if (cand % lane_mult == 0 and cand <= _round_up(d_hid, lane_mult)
                        and chunked_fp(tile_m, cand) <= budget):
                    hid_tile = cand
                    break
        hid_tile = _round_up(hid_tile, lane_mult)
        while tile_m > 8 and chunked_fp(tile_m, hid_tile) > budget:
            tile_m = _round_up(max(8, tile_m // 2), 8)
        d_hid_p = _round_up(d_hid, hid_tile)

    # ---- operand preparation (weights cast once; no M-dim padding of activations) ---
    w1_p = jnp.pad(w1.astype(mm_dtype), ((0, d_in_p - d_in), (0, d_hid_p - d_hid)))
    w2_p = jnp.pad(w2.astype(mm_dtype), ((0, d_hid_p - d_hid), (0, d_in_p - d_in)))
    b1_p = jnp.pad(b1, (0, d_hid_p - d_hid)).reshape(1, d_hid_p)
    b2_p = jnp.pad(b2, (0, d_in_p - d_in)).reshape(1, d_in_p)
    g_p = jnp.pad(gamma, (0, d_in_p - d_in)).reshape(1, d_in_p)
    beta_p = jnp.pad(beta, (0, d_in_p - d_in)).reshape(1, d_in_p)

    x2d = x.reshape(M, d_in)
    if d_in_p != d_in:
        x2d = jnp.pad(x2d, ((0, 0), (0, d_in_p - d_in)))

    grid_m = pl.cdiv(M, tile_m)
    m_eff = grid_m * tile_m

    cost = pl.CostEstimate(
        flops=2 * m_eff * (d_in_p * d_hid_p + d_hid_p * d_in_p),
        transcendentals=m_eff,  # one rsqrt per row
        bytes_accessed=int(
            x2d.size * x_b + M * d_in_p * out_b
            + w1_p.size * w1_p.dtype.itemsize + w2_p.size * w2_p.dtype.itemsize
            + b1_p.size * b1_p.dtype.itemsize + b2_p.size * b2_p.dtype.itemsize
            + g_p.size * g_p.dtype.itemsize + beta_p.size * beta_p.dtype.itemsize),
    )

    if not use_chunked:
        kernel = functools.partial(_ffn_resident_kernel, d_in=d_in, eps=eps,
                                   mm_dtype=mm_dtype)
        out = pl.pallas_call(
            kernel,
            out_shape=jax.ShapeDtypeStruct((M, d_in_p), x.dtype),
            grid_spec=pltpu.PrefetchScalarGridSpec(
                num_scalar_prefetch=0,
                grid=(grid_m,),
                in_specs=[
                    pl.BlockSpec((tile_m, d_in_p), lambda i: (i, 0)),       # x (pipelined)
                    _const_spec((d_in_p, d_hid_p), lambda i: (0, 0)),       # W1 (resident)
                    _const_spec((1, d_hid_p), lambda i: (0, 0)),            # b1
                    _const_spec((d_hid_p, d_in_p), lambda i: (0, 0)),       # W2 (resident)
                    _const_spec((1, d_in_p), lambda i: (0, 0)),             # b2
                    _const_spec((1, d_in_p), lambda i: (0, 0)),             # gamma
                    _const_spec((1, d_in_p), lambda i: (0, 0)),             # beta
                ],
                out_specs=pl.BlockSpec((tile_m, d_in_p), lambda i: (i, 0)),
            ),
            compiler_params=pltpu.CompilerParams(
                dimension_semantics=("parallel",),
                vmem_limit_bytes=int(vmem_limit_bytes),
            ),
            cost_estimate=cost,
        )(x2d, w1_p, b1_p, w2_p, b2_p, g_p, beta_p)
    else:
        n_hid = d_hid_p // hid_tile
        kernel = functools.partial(_ffn_hid_chunked_kernel, d_in=d_in, eps=eps,
                                   mm_dtype=mm_dtype)
        out = pl.pallas_call(
            kernel,
            out_shape=jax.ShapeDtypeStruct((M, d_in_p), x.dtype),
            grid_spec=pltpu.PrefetchScalarGridSpec(
                num_scalar_prefetch=0,
                grid=(grid_m, n_hid),
                in_specs=[
                    pl.BlockSpec((tile_m, d_in_p), lambda i, k: (i, 0)),    # x (per row tile)
                    pl.BlockSpec((d_in_p, hid_tile), lambda i, k: (0, k)),  # W1 columns chunk
                    pl.BlockSpec((1, hid_tile), lambda i, k: (0, k)),       # b1 chunk
                    pl.BlockSpec((hid_tile, d_in_p), lambda i, k: (k, 0)),  # W2 rows chunk
                    _const_spec((1, d_in_p), lambda i, k: (0, 0)),          # b2
                    _const_spec((1, d_in_p), lambda i, k: (0, 0)),          # gamma
                    _const_spec((1, d_in_p), lambda i, k: (0, 0)),          # beta
                ],
                out_specs=pl.BlockSpec((tile_m, d_in_p), lambda i, k: (i, 0)),
                scratch_shapes=[pltpu.VMEM((tile_m, d_in_p), jnp.float32)],
            ),
            compiler_params=pltpu.CompilerParams(
                dimension_semantics=("parallel", "arbitrary"),
                vmem_limit_bytes=int(vmem_limit_bytes),
            ),
            cost_estimate=cost,
        )(x2d, w1_p, b1_p, w2_p, b2_p, g_p, beta_p)

    if d_in_p != d_in:
        out = out[:, :d_in]
    return out.reshape(batch, seq, d_in)


def reference(x, w1, b1, w2, b2, gamma, beta):
    """Pure-JAX reference mirroring the PyTorch forward (eval mode)."""
    h = jnp.maximum(x @ w1 + b1, 0.0)
    y = h @ w2 + b2
    y = y + x
    mean = jnp.mean(y, axis=-1, keepdims=True)
    var = jnp.mean((y - mean) ** 2, axis=-1, keepdims=True)
    return (y - mean) / jnp.sqrt(var + 1e-6) * gamma + beta


def _init_params(key, d_in, d_hid):
    k_w1, k_b1, k_w2, k_b2, k_g, k_bt = jax.random.split(key, 6)
    s1 = 1.0 / (d_in ** 0.5)
    s2 = 1.0 / (d_hid ** 0.5)
    w1 = jax.random.uniform(k_w1, (d_in, d_hid), jnp.float32, -s1, s1)
    b1 = jax.random.uniform(k_b1, (d_hid,), jnp.float32, -s1, s1)
    w2 = jax.random.uniform(k_w2, (d_hid, d_in), jnp.float32, -s2, s2)
    b2 = jax.random.uniform(k_b2, (d_in,), jnp.float32, -s2, s2)
    gamma = jax.random.uniform(k_g, (d_in,), jnp.float32, 0.5, 1.5)
    beta = 0.1 * jax.random.normal(k_bt, (d_in,), jnp.float32)
    return w1, b1, w2, b2, gamma, beta


if __name__ == "__main__":
    key = jax.random.PRNGKey(0)
    k_x1, k_p1, k_x2, k_p2 = jax.random.split(key, 4)

    # ---- test 1 & 2: resident-weight path -------------------------------------------
    batch, seq, d_in, d_hid = 2, 8, 32, 64
    x = jax.random.normal(k_x1, (batch, seq, d_in), dtype=jnp.float32)
    w1, b1, w2, b2, gamma, beta = _init_params(k_p1, d_in, d_hid)
    ref = reference(x, w1, b1, w2, b2, gamma, beta)

    # f32 matmul path (tight tolerance)
    out_f32 = jax.block_until_ready(
        positionwise_feed_forward(x, w1, b1, w2, b2, gamma, beta,
                                  matmul_dtype=jnp.float32))
    assert out_f32.shape == (batch, seq, d_in)
    assert jnp.allclose(out_f32, ref, atol=1e-4, rtol=1e-4), "f32 path mismatch"

    # default path: bf16 MXU operands, f32 accumulate/epilogue (loose tolerance)
    out_def = jax.block_until_ready(
        positionwise_feed_forward(x, w1, b1, w2, b2, gamma, beta))
    assert jnp.allclose(out_def, ref, atol=1e-1, rtol=5e-2), "bf16 path mismatch"

    # ---- test 3: forced d_hid-chunked path with ragged M (masked last row tile) -----
    batch2, seq2, d_in2, d_hid2 = 2, 9, 32, 512
    x2 = jax.random.normal(k_x2, (batch2, seq2, d_in2), dtype=jnp.float32)
    w1c, b1c, w2c, b2c, gammac, betac = _init_params(k_p2, d_in2, d_hid2)
    ref2 = reference(x2, w1c, b1c, w2c, b2c, gammac, betac)

    out_ck = jax.block_until_ready(
        positionwise_feed_forward(x2, w1c, b1c, w2c, b2c, gammac, betac,
                                  matmul_dtype=jnp.float32,
                                  force_hid_chunking=True, hid_tile=128, tile_m=8))
    assert out_ck.shape == (batch2, seq2, d_in2)
    assert jnp.allclose(out_ck, ref2, atol=1e-4, rtol=1e-4), "chunked path mismatch"

    print("KERNEL_OK")
</pallas_src>

<mosaic_0001>
module attributes {stable_mosaic.version = 11 : i64} {
  func.func @_ffn_resident_kernel(%arg0: i32, %arg1: memref<16x128xf32, #tpu.memory_space<vmem>>, %arg2: memref<128x128xf32, #tpu.memory_space<vmem>>, %arg3: memref<1x128xf32, #tpu.memory_space<vmem>>, %arg4: memref<128x128xf32, #tpu.memory_space<vmem>>, %arg5: memref<1x128xf32, #tpu.memory_space<vmem>>, %arg6: memref<1x128xf32, #tpu.memory_space<vmem>>, %arg7: memref<1x128xf32, #tpu.memory_space<vmem>>, %arg8: memref<16x128xf32, #tpu.memory_space<vmem>>) attributes {dimension_semantics = [#tpu.dimension_semantics<parallel>], iteration_bounds = array<i64: 1>, scalar_prefetch = 0 : i64, scratch_operands = 0 : i64, tpu.core_type = #tpu.core_type<tc>, window_params = [{transform_indices = @transform_0, window_bounds = array<i64: 16, 128>}, {pipeline_mode = #tpu.pipeline_mode<synchronous>, transform_indices = @transform_1, window_bounds = array<i64: 128, 128>}, {pipeline_mode = #tpu.pipeline_mode<synchronous>, transform_indices = @transform_2, window_bounds = array<i64: 1, 128>}, {pipeline_mode = #tpu.pipeline_mode<synchronous>, transform_indices = @transform_3, window_bounds = array<i64: 128, 128>}, {pipeline_mode = #tpu.pipeline_mode<synchronous>, transform_indices = @transform_4, window_bounds = array<i64: 1, 128>}, {pipeline_mode = #tpu.pipeline_mode<synchronous>, transform_indices = @transform_5, window_bounds = array<i64: 1, 128>}, {pipeline_mode = #tpu.pipeline_mode<synchronous>, transform_indices = @transform_6, window_bounds = array<i64: 1, 128>}, {transform_indices = @transform_7, window_bounds = array<i64: 16, 128>}]} {
    %c0 = arith.constant 0 : index
    %c0_0 = arith.constant 0 : index
    %0 = vector.load %arg1[%c0, %c0_0] : memref<16x128xf32, #tpu.memory_space<vmem>>, vector<16x128xf32>
    %c0_1 = arith.constant 0 : index
    %c0_2 = arith.constant 0 : index
    %1 = vector.load %arg2[%c0_1, %c0_2] : memref<128x128xf32, #tpu.memory_space<vmem>>, vector<128x128xf32>
    %cst = arith.constant dense<0.000000e+00> : vector<16x128xf32>
    %2 = tpu.matmul %0, %1, %cst {dimension_numbers = #tpu.dot_dimension_numbers<[1], [0], [0], [1], [0, 0, 1, 1], [], []>} : vector<16x128xf32>, vector<128x128xf32>, vector<16x128xf32> -> vector<16x128xf32>
    %c0_3 = arith.constant 0 : index
    %c0_4 = arith.constant 0 : index
    %3 = vector.load %arg3[%c0_3, %c0_4] : memref<1x128xf32, #tpu.memory_space<vmem>>, vector<1x128xf32>
    %4 = vector.broadcast %3 : vector<1x128xf32> to vector<16x128xf32>
    %5 = arith.addf %2, %4 : vector<16x128xf32>
    %cst_5 = arith.constant 0.000000e+00 : f32
    %6 = vector.broadcast %cst_5 : f32 to vector<16x128xf32>
    %7 = arith.maximumf %5, %6 : vector<16x128xf32>
    %c0_6 = arith.constant 0 : index
    %c0_7 = arith.constant 0 : index
    %8 = vector.load %arg4[%c0_6, %c0_7] : memref<128x128xf32, #tpu.memory_space<vmem>>, vector<128x128xf32>
    %cst_8 = arith.constant dense<0.000000e+00> : vector<16x128xf32>
    %9 = tpu.matmul %7, %8, %cst_8 {dimension_numbers = #tpu.dot_dimension_numbers<[1], [0], [0], [1], [0, 0, 1, 1], [], []>} : vector<16x128xf32>, vector<128x128xf32>, vector<16x128xf32> -> vector<16x128xf32>
    %c0_9 = arith.constant 0 : index
    %c0_10 = arith.constant 0 : index
    %10 = vector.load %arg5[%c0_9, %c0_10] : memref<1x128xf32, #tpu.memory_space<vmem>>, vector<1x128xf32>
    %11 = vector.broadcast %10 : vector<1x128xf32> to vector<16x128xf32>
    %12 = arith.addf %9, %11 : vector<16x128xf32>
    %13 = arith.addf %12, %0 : vector<16x128xf32>
    %c0_11 = arith.constant 0 : index
    %c0_12 = arith.constant 0 : index
    %14 = vector.load %arg6[%c0_11, %c0_12] : memref<1x128xf32, #tpu.memory_space<vmem>>, vector<1x128xf32>
    %c0_13 = arith.constant 0 : index
    %c0_14 = arith.constant 0 : index
    %15 = vector.load %arg7[%c0_13, %c0_14] : memref<1x128xf32, #tpu.memory_space<vmem>>, vector<1x128xf32>
    %cst_15 = arith.constant dense<0.000000e+00> : vector<16xf32>
    %16 = vector.multi_reduction <add>, %13, %cst_15 [1] : vector<16x128xf32> to vector<16xf32>
    %17 = vector.shape_cast %16 : vector<16xf32> to vector<16x1xf32>
    %cst_16 = arith.constant 3.125000e-02 : f32
    %18 = vector.broadcast %cst_16 : f32 to vector<16x1xf32>
    %19 = arith.mulf %17, %18 : vector<16x1xf32>
    %20 = vector.broadcast %19 : vector<16x1xf32> to vector<16x128xf32>
    %21 = arith.subf %13, %20 : vector<16x128xf32>
    %22 = tpu.iota {dimensions = array<i32: 1>} : vector<1x128xi32>
    %c32_i32 = arith.constant 32 : i32
    %23 = vector.broadcast %c32_i32 : i32 to vector<1x128xi32>
    %24 = arith.cmpi slt, %22, %23 : vector<1x128xi32>
    %25 = arith.extui %24 : vector<1x128xi1> to vector<1x128xi32>
    %26 = arith.sitofp %25 : vector<1x128xi32> to vector<1x128xf32>
    %27 = vector.broadcast %26 : vector<1x128xf32> to vector<16x128xf32>
    %28 = arith.mulf %21, %27 : vector<16x128xf32>
    %29 = arith.mulf %28, %28 : vector<16x128xf32>
    %cst_17 = arith.constant dense<0.000000e+00> : vector<16xf32>
    %30 = vector.multi_reduction <add>, %29, %cst_17 [1] : vector<16x128xf32> to vector<16xf32>
    %31 = vector.shape_cast %30 : vector<16xf32> to vector<16x1xf32>
    %cst_18 = arith.constant 3.125000e-02 : f32
    %32 = vector.broadcast %cst_18 : f32 to vector<16x1xf32>
    %33 = arith.mulf %31, %32 : vector<16x1xf32>
    %cst_19 = arith.constant 9.99999997E-7 : f32
    %34 = vector.broadcast %cst_19 : f32 to vector<16x1xf32>
    %35 = arith.addf %33, %34 : vector<16x1xf32>
    %36 = math.rsqrt %35 : vector<16x1xf32>
    %37 = vector.broadcast %36 : vector<16x1xf32> to vector<16x128xf32>
    %38 = arith.mulf %28, %37 : vector<16x128xf32>
    %39 = vector.broadcast %14 : vector<1x128xf32> to vector<16x128xf32>
    %40 = arith.mulf %38, %39 : vector<16x128xf32>
    %41 = vector.broadcast %15 : vector<1x128xf32> to vector<16x128xf32>
    %42 = arith.addf %40, %41 : vector<16x128xf32>
    %c0_20 = arith.constant 0 : index
    %c0_21 = arith.constant 0 : index
    %43 = vector.load %arg8[%c0_20, %c0_21] : memref<16x128xf32, #tpu.memory_space<vmem>>, vector<16x128xf32>
    tpu.vector_store %arg8[%c0_20, %c0_21], %42 {strides = array<i32>} : memref<16x128xf32, #tpu.memory_space<vmem>>, vector<16x128xf32>,
    return
  }
  func.func @transform_0(%arg0: i32) -> (i32, i32) {
    %c0_i32 = arith.constant 0 : i32
    %c0_i32_0 = arith.constant 0 : i32
    return %arg0, %c0_i32 : i32, i32
  }
  func.func @transform_1(%arg0: i32) -> (i32, i32) {
    %c0_i32 = arith.constant 0 : i32
    %c0_i32_0 = arith.constant 0 : i32
    %c0_i32_1 = arith.constant 0 : i32
    return %c0_i32, %c0_i32_0 : i32, i32
  }
  func.func @transform_2(%arg0: i32) -> (i32, i32) {
    %c0_i32 = arith.constant 0 : i32
    %c0_i32_0 = arith.constant 0 : i32
    %c0_i32_1 = arith.constant 0 : i32
    return %c0_i32, %c0_i32_0 : i32, i32
  }
  func.func @transform_3(%arg0: i32) -> (i32, i32) {
    %c0_i32 = arith.constant 0 : i32
    %c0_i32_0 = arith.constant 0 : i32
    %c0_i32_1 = arith.constant 0 : i32
    return %c0_i32, %c0_i32_0 : i32, i32
  }
  func.func @transform_4(%arg0: i32) -> (i32, i32) {
    %c0_i32 = arith.constant 0 : i32
    %c0_i32_0 = arith.constant 0 : i32
    %c0_i32_1 = arith.constant 0 : i32
    return %c0_i32, %c0_i32_0 : i32, i32
  }
  func.func @transform_5(%arg0: i32) -> (i32, i32) {
    %c0_i32 = arith.constant 0 : i32
    %c0_i32_0 = arith.constant 0 : i32
    %c0_i32_1 = arith.constant 0 : i32
    return %c0_i32, %c0_i32_0 : i32, i32
  }
  func.func @transform_6(%arg0: i32) -> (i32, i32) {
    %c0_i32 = arith.constant 0 : i32
    %c0_i32_0 = arith.constant 0 : i32
    %c0_i32_1 = arith.constant 0 : i32
    return %c0_i32, %c0_i32_0 : i32, i32
  }
  func.func @transform_7(%arg0: i32) -> (i32, i32) {
    %c0_i32 = arith.constant 0 : i32
    %c0_i32_0 = arith.constant 0 : i32
    return %arg0, %c0_i32 : i32, i32
  }
}

</mosaic_0001>

<bundles_post_ra>
// kernel: tpu_custom_call.1
= control target key start
LH: loop header
LB: loop body
LE: loop exit
PB: predicated region body
PF: predicated region fallthrough
CT: control target
= control target key end

     0   :  { %12 = vsyncpa [#allocation3], 0  ;;  %s938_s0 = inlined_call_operand.hbm [shape: f32[16,128], index: 0, kind: input, shape index: {}]   ;;  %s939_s1 = inlined_call_operand.hbm [shape: f32[128,128], index: 1, kind: input, shape index: {}]   ;;  %s940_s2 = inlined_call_operand.hbm [shape: f32[1,128], index: 2, kind: input, shape index: {}]   ;;  %s941_s3 = inlined_call_operand.hbm [shape: f32[128,128], index: 3, kind: input, shape index: {}]   ;;  %s942_s4 = inlined_call_operand.hbm [shape: f32[1,128], index: 4, kind: input, shape index: {}]   ;;  %s943_s5 = inlined_call_operand.hbm [shape: f32[1,128], index: 5, kind: input, shape index: {}]   ;;  %s944_s6 = inlined_call_operand.hbm [shape: f32[1,128], index: 6, kind: input, shape index: {}]   ;;  %s945_s7 = inlined_call_operand.hbm [shape: f32[16,128], index: 7, kind: output, shape index: {}]  }
   0x1   :  { %13 = vsyncpa [#allocation6], 0 }
   0x2   :  { %14 = vsyncpa [#allocation9], 0 }
   0x3   :  { %15 = vsyncpa [#allocation12], 0 }
   0x4   :  { %16 = vsyncpa [#allocation4], 0  ;;  %s761_s24 = smov [#allocation5]   ;;  %s762_s26 = smov [#allocation8]  }
   0x5   :  { %s34_s25 = sshll.u32 %s761_s24, 4  ;;  %s56_s27 = sshll.u32 %s762_s26, 4  ;;  %s35_s25 = int_to_ptr.vmem [resolvable:$true] %s34_s25  ;;  %s812_s27 = int_to_ptr.vmem [resolvable:$true] %s56_s27 }
   0x6   :  { %s575_s30 = scalar_lea.hbm %s939_s1, 2048 }
   0x7   :  { %p576_p0 = scmp.ne.s32.totalorder %s939_s1, %s575_s30  ;;  %p579_p1 = scmp.lt.u32.totalorder %s575_s30, %s939_s1 }
   0x9   :  { %p581_p2 = pnand %p579_p1, %p576_p0 }
   0xb   :  { %584 = shalt.err (!%p581_p2)
}
   0xc   :  { %s585_s12 = scalar_lea.vmem %s35_s25, 2048  ;;  %p590_p4 = scmp.lt.s32.totalorder %s35_s25, %s35_s25 }
   0xd   :  { %p586_p3 = scmp.ne.s32.totalorder %s35_s25, %s585_s12  ;;  %p591_p5 = scmp.lt.s32.totalorder %s585_s12, %s585_s12 }
   0xf   :  { %p592_p6 = por %p591_p5, %p590_p4 }
  0x11   :  { %p593_p7 = pnand %p592_p6, %p586_p3 }
  0x13   :  { %596 = shalt.err (!%p593_p7)
}
  0x14   :  { %s763_s13 = smov 128   ;;  %s764_s14 = smov 8  }
  0x15   :  { %40 = dma.hbm_to_vmem [thread:$0]  %s939_s1, 2048, %s35_s25, [#allocation6], %s763_s13, %s763_s13, %s764_s14  }
  0x16   :  { %s597_s19 = scalar_lea.hbm %s941_s3, 2048 }
  0x17   :  { %p598_p8 = scmp.ne.s32.totalorder %s941_s3, %s597_s19  ;;  %p601_p9 = scmp.lt.u32.totalorder %s597_s19, %s941_s3 }
  0x19   :  { %p603_p10 = pnand %p601_p9, %p598_p8 }
  0x1b   :  { %606 = shalt.err (!%p603_p10)
}
  0x1c   :  { %s607_s24 = scalar_lea.vmem %s812_s27, 2048  ;;  %p612_p12 = scmp.lt.s32.totalorder %s812_s27, %s812_s27 }
  0x1d   :  { %p608_p11 = scmp.ne.s32.totalorder %s812_s27, %s607_s24  ;;  %p613_p13 = scmp.lt.s32.totalorder %s607_s24, %s607_s24 }
  0x1f   :  { %p614_p0 = por %p613_p13, %p612_p12 }
  0x21   :  { %p615_p1 = pnand %p614_p0, %p608_p11 }
  0x23   :  { %618 = shalt.err (!%p615_p1)
}
  0x24   :  { %62 = dma.hbm_to_vmem [thread:$0]  %s941_s3, 2048, %s812_s27, [#allocation9], %s763_s13, %s763_s13, %s764_s14  }
  0x25   :  { %s765_s26 = smov [#allocation11]   ;;  %s766_s29 = smov [#allocation2]  }
  0x26   :  { %s79_s28 = sshll.u32 %s765_s26, 4  ;;  %s22_s30 = sshll.u32 %s766_s29, 4  ;;  %s80_s28 = int_to_ptr.vmem [resolvable:$true] %s79_s28  ;;  %s849_s30 = int_to_ptr.vmem [resolvable:$true] %s22_s30 }
  0x27   :  { %s619_s10 = scalar_lea.hbm %s943_s5, 16 }
  0x28   :  { %p620_p2 = scmp.ne.s32.totalorder %s943_s5, %s619_s10  ;;  %p623_p3 = scmp.lt.u32.totalorder %s619_s10, %s943_s5 }
  0x2a   :  { %p625_p4 = pnand %p623_p3, %p620_p2 }
  0x2c   :  { %628 = shalt.err (!%p625_p4)
}
  0x2d   :  { %s629_s3 = scalar_lea.vmem %s80_s28, 16  ;;  %s633_s27 = scalar_lea.vmem %s80_s28, 32 }
  0x2e   :  { %p630_p5 = scmp.ne.s32.totalorder %s80_s28, %s629_s3  ;;  %p634_p6 = scmp.lt.s32.totalorder %s80_s28, %s80_s28 }
  0x2f   :  { %p635_p7 = scmp.lt.s32.totalorder %s633_s27, %s629_s3 }
  0x31   :  { %p636_p8 = por %p635_p7, %p634_p6 }
  0x33   :  { %p637_p9 = pnand %p636_p8, %p630_p5 }
  0x35   :  { %640 = shalt.err (!%p637_p9)
}
  0x36   :  { %82 = dma.hbm_to_vmem [thread:$0]  %s943_s5, 16, %s80_s28, [#allocation12]  }
  0x37   :  { %s641_s21 = scalar_lea.hbm %s938_s0, 256 }
  0x38   :  { %p642_p10 = scmp.ne.s32.totalorder %s938_s0, %s641_s21  ;;  %p645_p11 = scmp.lt.u32.totalorder %s641_s21, %s938_s0 }
  0x3a   :  { %p647_p12 = pnand %p645_p11, %p642_p10 }
  0x3c   :  { %650 = shalt.err (!%p647_p12)
}
  0x3d   :  { %s651_s25 = scalar_lea.vmem %s849_s30, 256  ;;  %p656_p0 = scmp.lt.s32.totalorder %s849_s30, %s849_s30 }
  0x3e   :  { %p652_p13 = scmp.ne.s32.totalorder %s849_s30, %s651_s25  ;;  %p657_p1 = scmp.lt.s32.totalorder %s651_s25, %s651_s25 }
  0x40   :  { %p658_p2 = por %p657_p1, %p656_p0 }
  0x42   :  { %p659_p3 = pnand %p658_p2, %p652_p13 }
  0x44   :  { %662 = shalt.err (!%p659_p3)
}
  0x45   :  { %28 = dma.hbm_to_vmem [thread:$0]  %s938_s0, 256, %s849_s30, [#allocation3], %s763_s13, %s763_s13, %s764_s14  }
  0x46   :  { %s767_s28 = smov [#allocation7]   ;;  %s768_s8 = smov [#allocation10]  }
  0x47   :  { %s47_s29 = sshll.u32 %s767_s28, 4  ;;  %s69_s9 = sshll.u32 %s768_s8, 4  ;;  %s48_s29 = int_to_ptr.vmem [resolvable:$true] %s47_s29  ;;  %s70_s9 = int_to_ptr.vmem [resolvable:$true] %s69_s9 }
  0x48   :  { %s663_s12 = scalar_lea.hbm %s940_s2, 16 }
  0x49   :  { %p664_p4 = scmp.ne.s32.totalorder %s940_s2, %s663_s12  ;;  %p667_p5 = scmp.lt.u32.totalorder %s663_s12, %s940_s2 }
  0x4b   :  { %p669_p6 = pnand %p667_p5, %p664_p4 }
  0x4d   :  { %672 = shalt.err (!%p669_p6)
}
  0x4e   :  { %s673_s0 = scalar_lea.vmem %s48_s29, 16  ;;  %s677_s30 = scalar_lea.vmem %s48_s29, 32 }
  0x4f   :  { %p674_p7 = scmp.ne.s32.totalorder %s48_s29, %s673_s0  ;;  %p678_p8 = scmp.lt.s32.totalorder %s48_s29, %s48_s29 }
  0x50   :  { %p679_p9 = scmp.lt.s32.totalorder %s677_s30, %s673_s0 }
  0x52   :  { %p680_p10 = por %p679_p9, %p678_p8 }
  0x54   :  { %p681_p11 = pnand %p680_p10, %p674_p7 }
  0x56   :  { %684 = shalt.err (!%p681_p11)
}
  0x57   :  { %50 = dma.hbm_to_vmem [thread:$0]  %s940_s2, 16, %s48_s29, [#allocation6]  }
  0x58   :  { %s685_s21 = scalar_lea.hbm %s942_s4, 16 }
  0x59   :  { %p686_p12 = scmp.ne.s32.totalorder %s942_s4, %s685_s21  ;;  %p689_p13 = scmp.lt.u32.totalorder %s685_s21, %s942_s4 }
  0x5b   :  { %p691_p0 = pnand %p689_p13, %p686_p12 }
  0x5d   :  { %694 = shalt.err (!%p691_p0)
}
  0x5e   :  { %s695_s25 = scalar_lea.vmem %s70_s9, 16  ;;  %s699_s5 = scalar_lea.vmem %s70_s9, 32 }
  0x5f   :  { %p696_p1 = scmp.ne.s32.totalorder %s70_s9, %s695_s25  ;;  %p700_p2 = scmp.lt.s32.totalorder %s70_s9, %s70_s9 }
  0x60   :  { %p701_p3 = scmp.lt.s32.totalorder %s699_s5, %s695_s25 }
  0x62   :  { %p702_p4 = por %p701_p3, %p700_p2 }
  0x64   :  { %p703_p5 = pnand %p702_p4, %p696_p1 }
  0x66   :  { %706 = shalt.err (!%p703_p5)
}
  0x67   :  { %72 = dma.hbm_to_vmem [thread:$0]  %s942_s4, 16, %s70_s9, [#allocation9]  }
  0x68   :  { %s769_s28 = smov [#allocation13]   ;;  %s707_s11 = scalar_lea.hbm %s944_s6, 16 }
  0x69   :  { %s89_s29 = sshll.u32 %s769_s28, 4  ;;  %p708_p6 = scmp.ne.s32.totalorder %s944_s6, %s707_s11  ;;  %s90_s29 = int_to_ptr.vmem [resolvable:$true] %s89_s29 }
  0x6a   :  { %p711_p7 = scmp.lt.u32.totalorder %s707_s11, %s944_s6 }
  0x6c   :  { %p713_p8 = pnand %p711_p7, %p708_p6 }
  0x6e   :  { %716 = shalt.err (!%p713_p8)
}
  0x6f   :  { %s717_s27 = scalar_lea.vmem %s90_s29, 16  ;;  %s721_s4 = scalar_lea.vmem %s90_s29, 32 }
  0x70   :  { %p718_p9 = scmp.ne.s32.totalorder %s90_s29, %s717_s27  ;;  %p722_p10 = scmp.lt.s32.totalorder %s90_s29, %s90_s29 }
  0x71   :  { %p723_p11 = scmp.lt.s32.totalorder %s721_s4, %s717_s27 }
  0x73   :  { %p724_p12 = por %p723_p11, %p722_p10 }
  0x75   :  { %p725_p13 = pnand %p724_p12, %p718_p9 }
  0x77   :  { %728 = shalt.err (!%p725_p13)
}
  0x78   :  { %92 = dma.hbm_to_vmem [thread:$0]  %s944_s6, 16, %s90_s29, [#allocation12]  }
  0x79   :  { %751 = dma.done.wait [#allocation3], 256  }
  0x7a   :  { %752 = vsyncadd [#allocation3], 4294967040 }
  0x7b   :  { %753 = dma.done.wait [#allocation6], 2064  }
  0x7c   :  { %754 = vsyncadd [#allocation6], 4294965232 }
  0x7d   :  { %755 = dma.done.wait [#allocation9], 2064  }
  0x7e   :  { %756 = vsyncadd [#allocation9], 4294965232 }
  0x7f   :  { %757 = dma.done.wait [#allocation12], 32  }
  0x80   :  { %758 = vsyncadd [#allocation12], 4294967264  ;;  %v116_v0 = vld [vmem:[#allocation5] sm:$0xff]  ;;  %v117_v1 = vld [vmem:[#allocation5 + $0x8] sm:$0xff]  ;;  %s771_s6 = smov [#allocation14]  }
  0x81   :  { %v118_v2 = vld [vmem:[#allocation5 + $0x10] sm:$0xff]  ;;  %v496_v3 = vpack.c.bf16 %v117_v1, %v116_v0  ;;  %v119_v4 = vld [vmem:[#allocation5 + $0x18] sm:$0xff]  ;;  %v120_v6 = vld [vmem:[#allocation5 + $0x20] sm:$0xff]  ;;  %v326_v0 = vlaneseq  ;;  %s370_s30 = sshll.u32 %s771_s6, 4  ;;  %s371_s30 = int_to_ptr.vmem [resolvable:$true] %s370_s30 }
  0x82   :  { %v500_v5 = vpack.c.bf16 %v119_v4, %v118_v2  ;;  %v121_v7 = vld [vmem:[#allocation5 + $0x28] sm:$0xff]  ;;  %v122_v9 = vld [vmem:[#allocation5 + $0x30] sm:$0xff]  ;;  %v123_v10 = vld [vmem:[#allocation5 + $0x38] sm:$0xff]  ;;  %v770_v4 = vmov 0.0   ;;  %s729_s17 = scalar_lea.vmem %s371_s30, 256  ;;  %p734_p1 = scmp.lt.s32.totalorder %s371_s30, %s371_s30 }
  0x83   :  { %497 = vmatprep.subr.bf16.mxu0 %v496_v3  ;;  %v504_v8 = vpack.c.bf16 %v121_v7, %v120_v6  ;;  %v919_v11 = vld [vmem:[#allocation2] sm:$0xff]  ;;  %v216_v12 = vld [vmem:[#allocation8] sm:$0xff]  ;;  %v219_v16 = vld [vmem:[#allocation8 + $0x18] sm:$0xff]  ;;  %v508_v20 = vpack.c.bf16 %v123_v10, %v122_v9  ;;  %v327_v1 = vand.u32 127, %v326_v0  ;;  %p730_p0 = scmp.ne.s32.totalorder %s371_s30, %s729_s17  ;;  %p735_p2 = scmp.lt.s32.totalorder %s729_s17, %s729_s17 }
  0x84   :  { %499 = vmatpush3.bf16.msra.mxu0 %v496_v3  ;;  %458 = vmatprep.mubr.f32.mxu0 %v919_v11  ;;  %v217_v13 = vld [vmem:[#allocation8 + $0x8] sm:$0xff]  ;;  %v218_v14 = vld [vmem:[#allocation8 + $0x10] sm:$0xff]  ;;  %v220_v18 = vld [vmem:[#allocation8 + $0x20] sm:$0xff] }
  0x85   :  { %501 = vmatprep.subr.bf16.mxu0 %v500_v5  ;;  %v528_v15 = vpack.c.bf16 %v217_v13, %v216_v12  ;;  %v532_v17 = vpack.c.bf16 %v219_v16, %v218_v14  ;;  %v221_v19 = vld [vmem:[#allocation8 + $0x28] sm:$0xff]  ;;  %v124_v21 = vld [vmem:[#allocation5 + $0x40] sm:$0xff]  ;;  %v222_v24 = vld [vmem:[#allocation8 + $0x30] sm:$0xff]  ;;  %vm328_vm0 = vcmp.lt.s32.totalorder %v327_v1, 32  ;;  %p736_p3 = por %p735_p2, %p734_p1 }
  0x86   :  { %v125_v22 = vld [vmem:[#allocation5 + $0x48] sm:$0xff]  ;;  %v536_v23 = vpack.c.bf16 %v221_v19, %v220_v18  ;;  %v223_v25 = vld [vmem:[#allocation8 + $0x38] sm:$0xff]  ;;  %v126_v27 = vld [vmem:[#allocation5 + $0x50] sm:$0xff] }
  0x87   :  { %529 = vmatprep.subr.bf16.mxu1 %v528_v15  ;;  %v512_v26 = vpack.c.bf16 %v125_v22, %v124_v21  ;;  %v127_v28 = vld [vmem:[#allocation5 + $0x58] sm:$0xff]  ;;  %v540_v29 = vpack.c.bf16 %v223_v25, %v222_v24  ;;  %v224_v30 = vld [vmem:[#allocation8 + $0x40] sm:$0xff]  ;;  %v225_v31 = vld [vmem:[#allocation8 + $0x48] sm:$0xff]  ;;  %p737_p4 = pnand %p736_p3, %p730_p0 }
  0x88   :  { %503 = vmatpush3.bf16.msra.mxu0 %v500_v5  ;;  %531 = vmatpush3.bf16.msra.mxu1 %v528_v15  ;;  %v516_v32 = vpack.c.bf16 %v127_v28, %v126_v27  ;;  %v128_v33 = vld [vmem:[#allocation5 + $0x60] sm:$0xff]  ;;  %v129_v34 = vld [vmem:[#allocation5 + $0x68] sm:$0xff]  ;;  %v544_v35 = vpack.c.bf16 %v225_v31, %v224_v30  ;;  %v226_v36 = vld [vmem:[#allocation8 + $0x50] sm:$0xff]  ;;  %v387_v5 = vsel %vm328_vm0, 1.0, %v770_v4 }
  0x89   :  { %505 = vmatprep.subr.bf16.mxu0 %v504_v8  ;;  %533 = vmatprep.subr.bf16.mxu1 %v532_v17  ;;  %v227_v37 = vld [vmem:[#allocation8 + $0x58] sm:$0xff]  ;;  %v520_v38 = vpack.c.bf16 %v129_v34, %v128_v33  ;;  %v130_v39 = vld [vmem:[#allocation5 + $0x70] sm:$0xff]  ;;  %v228_v42 = vld [vmem:[#allocation8 + $0x60] sm:$0xff] }
  0x8a   :  { %v131_v40 = vld [vmem:[#allocation5 + $0x78] sm:$0xff]  ;;  %v548_v41 = vpack.c.bf16 %v227_v37, %v226_v36  ;;  %v229_v43 = vld [vmem:[#allocation8 + $0x68] sm:$0xff]  ;;  %v385_v50 = vld [vmem:[#allocation7] ss:$0 sm:$0xff] }
  0x8b   :  { %v524_v44 = vpack.c.bf16 %v131_v40, %v130_v39  ;;  %v552_v45 = vpack.c.bf16 %v229_v43, %v228_v42  ;;  %v115_v46 = vld [vmem:[#allocation2 + $0x8] sm:$0xff]  ;;  %v386_v57 = vld [vmem:[#allocation10] ss:$0 sm:$0xff]  ;;  %v388_v21 = vld [vmem:[#allocation11] ss:$0 sm:$0xff] }
  0x8c   :  { %507 = vmatpush3.bf16.msra.mxu0 %v504_v8  ;;  %535 = vmatpush3.bf16.msra.mxu1 %v532_v17  ;;  %v230_v47 = vld [vmem:[#allocation8 + $0x70] sm:$0xff]  ;;  %v231_v48 = vld [vmem:[#allocation8 + $0x78] sm:$0xff] }
  0x8d   :  { %509 = vmatprep.subr.bf16.mxu0 %v508_v20  ;;  %537 = vmatprep.subr.bf16.mxu1 %v536_v23  ;;  %v556_v49 = vpack.c.bf16 %v231_v48, %v230_v47 }
  0x90   :  { %511 = vmatpush3.bf16.msra.mxu0 %v508_v20  ;;  %539 = vmatpush3.bf16.msra.mxu1 %v536_v23  ;;  %v389_v23 = vld [vmem:[#allocation13] ss:$0 sm:$0xff] }
  0x91   :  { %513 = vmatprep.subr.bf16.mxu0 %v512_v26  ;;  %541 = vmatprep.subr.bf16.mxu1 %v540_v29 }
  0x94   :  { %515 = vmatpush3.bf16.msra.mxu0 %v512_v26  ;;  %543 = vmatpush3.bf16.msra.mxu1 %v540_v29 }
  0x95   :  { %517 = vmatprep.subr.bf16.mxu0 %v516_v32  ;;  %545 = vmatprep.subr.bf16.mxu1 %v544_v35 }
  0x98   :  { %519 = vmatpush3.bf16.msra.mxu0 %v516_v32  ;;  %547 = vmatpush3.bf16.msra.mxu1 %v544_v35 }
  0x99   :  { %521 = vmatprep.subr.bf16.mxu0 %v520_v38  ;;  %549 = vmatprep.subr.bf16.mxu1 %v548_v41 }
  0x9c   :  { %523 = vmatpush3.bf16.msra.mxu0 %v520_v38  ;;  %551 = vmatpush3.bf16.msra.mxu1 %v548_v41 }
  0x9d   :  { %525 = vmatprep.subr.bf16.mxu0 %v524_v44  ;;  %553 = vmatprep.subr.bf16.mxu1 %v552_v45 }
  0xa0   :  { %527 = vmatpush3.bf16.msra.mxu0 %v524_v44  ;;  %555 = vmatpush3.bf16.msra.mxu1 %v552_v45 }
  0xa1   :  { %557 = vmatprep.subr.bf16.mxu1 %v556_v49 }
  0xa3   :  { %459 = vmatmul.mubr.f32.vlgmr.msra.gmra.mrb[0].mxu0 %v115_v46 }
  0xa4   :  { %559 = vmatpush3.bf16.msra.mxu1 %v556_v49 }
 0x176   :  { %v460_v51 = vpop.f32.mrb[0].mxu0 }
 0x177   :  { %v211_v52 = vadd.f32 %v460_v51, %v385_v50  ;;  %v205_v53 = vpop.f32.mrb[1].mxu0 }
 0x178   :  { %v206_v54 = vadd.f32 %v385_v50, %v205_v53 }
 0x179   :  { %v215_v56 = vmax.f32 %v211_v52, 0.0 }
 0x17a   :  { %v214_v55 = vmax.f32 %v206_v54, 0.0 }
 0x17c   :  { %493 = vmatprep.mubr.f32.mxu1 %v214_v55 }
 0x17d   :  { %494 = vmatmul.mubr.f32.vlgmr.msra.gmra.mrb[0].mxu1 %v215_v56 }
 0x250   :  { %v495_v58 = vpop.f32.mrb[0].mxu1 }
 0x251   :  { %v305_v59 = vpop.f32.mrb[1].mxu1  ;;  %v311_v61 = vadd.f32 %v495_v58, %v386_v57 }
 0x252   :  { %v306_v60 = vadd.f32 %v386_v57, %v305_v59 }
 0x253   :  { %v315_v63 = vadd.f32 %v311_v61, %v115_v46 }
 0x254   :  { %v314_v62 = vadd.f32 %v306_v60, %v919_v11 }
 0x256   :  { %318 = vadd.xlane.f32.xlu0 %v314_v62 }
 0x25a   :  { %320 = vadd.xlane.f32.xlu0 %v315_v63 }
 0x2e3   :  { %v319_v2 = vpop.xlane.xlu0 %318 }
 0x2e4   :  { %v322_v3 = vmul.f32 0.03125, %v319_v2 }
 0x2e6   :  { %v324_v6 = vsub.f32 %v314_v62, %v322_v3 }
 0x2e7   :  { %v321_v7 = vpop.xlane.xlu0 %320 }
 0x2e8   :  { %v323_v8 = vmul.f32 0.03125, %v321_v7  ;;  %v331_v9 = vmul.f32 %v387_v5, %v324_v6 }
 0x2ea   :  { %v325_v10 = vsub.f32 %v315_v63, %v323_v8  ;;  %v333_v12 = vmul.f32 %v331_v9, %v331_v9 }
 0x2ec   :  { %335 = vadd.xlane.f32.xlu1 %v333_v12  ;;  %v332_v13 = vmul.f32 %v387_v5, %v325_v10 }
 0x2ee   :  { %v334_v14 = vmul.f32 %v332_v13, %v332_v13 }
 0x2f0   :  { %337 = vadd.xlane.f32.xlu1 %v334_v14 }
 0x379   :  { %v336_v11 = vpop.xlane.xlu1 %335 }
 0x37a   :  { %v339_v15 = vmul.f32 0.03125, %v336_v11 }
 0x37c   :  { %v341_v16 = vadd.f32 1e-06, %v339_v15 }
 0x37d   :  { %v338_v17 = vpop.xlane.xlu1 %337 }
 0x37e   :  { %571 = vrsqrt.f32 %v341_v16  ;;  %v340_v18 = vmul.f32 0.03125, %v338_v17 }
 0x380   :  { %v342_v19 = vadd.f32 1e-06, %v340_v18 }
 0x382   :  { %573 = vrsqrt.f32 %v342_v19 }
 0x388   :  { %v572_v20 = vpop.eup %571 }
 0x389   :  { %v345_v22 = vmul.f32 %v572_v20, %v331_v9 }
 0x38b   :  { %v353_v24 = vmul.f32 %v388_v21, %v345_v22 }
 0x38c   :  { %v574_v25 = vpop.eup %573 }
 0x38d   :  { %v346_v26 = vmul.f32 %v574_v25, %v332_v13  ;;  %v361_v27 = vadd.f32 %v389_v23, %v353_v24 }
 0x38f   :  { %v354_v28 = vmul.f32 %v388_v21, %v346_v26  ;;  %363 = vst [vmem:[#allocation14] sm:$0xff] %v361_v27 }
 0x391   :  { %v362_v29 = vadd.f32 %v389_v23, %v354_v28 }
 0x393   :  { %364 = vst [vmem:[#allocation14 + $0x8] sm:$0xff] %v362_v29 }
 0x394   :  { %740 = shalt.err (!%p737_p4)
}
 0x395   :  { %s741_s20 = scalar_lea.hbm %s945_s7, 256 }
 0x396   :  { %p742_p5 = scmp.ne.s32.totalorder %s945_s7, %s741_s20  ;;  %p745_p6 = scmp.lt.u32.totalorder %s741_s20, %s945_s7 }
 0x398   :  { %p747_p7 = pnand %p745_p6, %p742_p5 }
 0x39a   :  { %750 = shalt.err (!%p747_p7)
}
 0x39b   :  { %376 = dma.vmem_to_hbm [thread:$0]  %s371_s30, 256, %s945_s7, [#allocation4], %s763_s13, %s763_s13, %s764_s14  }
 0x39c   :  { %759 = dma.done.wait [#allocation4], 256  }
 0x39d   :  { %760 = vsyncadd [#allocation4], 4294967040 }
 0x39e   :  { %380 = vsyncpa [#allocation3], 1 }
 0x39f   :  { %381 = vsyncpa [#allocation6], 1 }
 0x3a0   :  { %382 = vsyncpa [#allocation9], 1 }
 0x3a1   :  { %383 = vsyncpa [#allocation12], 1 }
 0x3a2   :  { %384 = vsyncpa [#allocation4], 1 }

</bundles_post_ra>
